<compile_context>
chip_gen: v7x
topology: tpu7x:2x2x1
jax: 0.10.0
libtpu: 0.0.40
codegen_flags: <defaults>
</compile_context>

<pallas_src>
import jax
import jax.numpy as jnp
from jax.experimental import pallas as pl
from jax.experimental.pallas import tpu as pltpu

_LANE = 128
_TARGET_STEP_BYTES = 4 << 20     # ~4 MiB of HBM traffic per grid step
_MIN_STEP_BYTES = 1 << 20        # don't split work below ~1 MiB per step
_VMEM_BUDGET_BYTES = 24 << 20    # budget for double-buffered tile footprint
_VMEM_LIMIT_BYTES = 32 << 20     # scoped VMEM limit (safe on v5e/v6e/v7x)
_MXU_MIN_K = 64                  # use MXU only when the contraction is big
_MAX_BATCH_BLOCK = 8             # cap images folded into one block


def _round_up(a, b):
    return (a + b - 1) // b * b


def _cdiv(a, b):
    return (a + b - 1) // b


def _choose_tiling(N, C_in, C_out, M, itemsize):
    """Pick (batch_block, tile_m, n_pixel_tiles, M_pad)."""
    bytes_per_pix = (C_in + C_out) * itemsize
    M128 = _round_up(M, _LANE)

    # Pixels per grid step that hit the HBM byte target, capped so the
    # double-buffered VMEM footprint stays inside the budget.
    target_pix = max(_LANE, (_TARGET_STEP_BYTES // bytes_per_pix) // _LANE * _LANE)
    vmem_cap_pix = max(_LANE, (_VMEM_BUDGET_BYTES // (2 * bytes_per_pix)) // _LANE * _LANE)
    target_pix = min(target_pix, vmem_cap_pix)

    if M128 <= target_pix:
        # One pixel tile covers the whole image; fold batch images into the
        # block so small problems still move a decent chunk per step.
        tile_m, n_tiles = M128, 1
        bn = max(1, min(N, _MAX_BATCH_BLOCK, target_pix // M128))
        while N % bn:
            bn -= 1
    else:
        bn = 1
        # Prefer a 128-multiple tile that divides M128 exactly (no jnp.pad,
        # no extra HBM copy).  Fall back to a padded tiling if no divisor
        # gives a reasonably sized step.
        units = M128 // _LANE
        tgt_units = target_pix // _LANE
        cap_units = vmem_cap_pix // _LANE
        best = None
        d = 1
        while d * d <= units:
            if units % d == 0:
                for cand in (d, units // d):
                    if cand <= cap_units and (
                            best is None or abs(cand - tgt_units) < abs(best - tgt_units)):
                        best = cand
            d += 1
        if best is not None and best * _LANE * bytes_per_pix >= _MIN_STEP_BYTES:
            tile_m = best * _LANE
            n_tiles = units // best
        else:
            n_tiles = _cdiv(M128, target_pix)
            tile_m = _round_up(_cdiv(M128, n_tiles), _LANE)

    # v7x has two TensorCores and both grid axes are "parallel": keep >= 2
    # grid steps whenever each half would still move a decent amount of data.
    total_bytes = N * M128 * bytes_per_pix
    if (N // bn) * n_tiles < 2 and total_bytes >= 2 * _MIN_STEP_BYTES:
        if bn > 1:
            bn2 = bn // 2
            while N % bn2:
                bn2 -= 1
            bn = max(1, bn2)
        elif tile_m >= 2 * _LANE:
            n_tiles = 2
            tile_m = _round_up(_cdiv(M128, 2), _LANE)

    M_pad = tile_m * n_tiles
    return bn, tile_m, n_tiles, M_pad


def _make_kernel(c_in, c_out, bn, use_mxu):
    def kernel(x_ref, w_ref, b_ref, o_ref):
        # x_ref: (BN, C_in, TM)  pixel tile, pixels on the lane axis
        # w_ref: (C_out, C_in)   full 1x1 conv weight (VMEM-resident)
        # b_ref: (C_out, 1)      full bias (VMEM-resident)
        # o_ref: (BN, C_out, TM) output tile (lane-dense, NCHW-native)
        w = w_ref[...]
        bias = b_ref[...].astype(jnp.float32)                 # (C_out, 1)
        if use_mxu:
            # Big contraction: one MXU matmul per folded image (bn is small).
            for n in range(bn):
                acc = jnp.dot(w, x_ref[n], preferred_element_type=jnp.float32)
                o_ref[n] = (acc + bias).astype(o_ref.dtype)
        else:
            # Tiny K: unrolled VPU broadcast-FMA; the MXU would run <1%
            # utilized and only add push/pop latency to a mem-bound kernel.
            x = x_ref[...].astype(jnp.float32)                 # (BN, C_in, TM)
            wf = w.astype(jnp.float32)                         # (C_out, C_in)
            acc = wf[None, :, 0:1] * x[:, 0:1, :] + bias[None]
            for c in range(1, c_in):
                acc = acc + wf[None, :, c:c + 1] * x[:, c:c + 1, :]
            o_ref[...] = acc.astype(o_ref.dtype)
    return kernel


def outconv_forward(x_nchw, weight, bias):
    """1x1 conv forward (NCHW, PyTorch Conv2d semantics).

    x_nchw : (N, C_in, H, W)
    weight : (C_out, C_in, 1, 1)
    bias   : (C_out,)
    returns (N, C_out, H, W)
    """
    N, C_in, H, W = x_nchw.shape
    C_out = weight.shape[0]
    M = H * W
    itemsize = jnp.dtype(x_nchw.dtype).itemsize

    bn, tile_m, n_tiles, M_pad = _choose_tiling(N, C_in, C_out, M, itemsize)

    # Glue: NCHW -> (N, C_in, H*W) is free.  The pad only fires when H*W is
    # not 128-aligned (or the rare indivisible-tiling fallback).
    x_3d = x_nchw.reshape(N, C_in, M)
    if M_pad != M:
        x_3d = jnp.pad(x_3d, ((0, 0), (0, 0), (0, M_pad - M)))

    w_mat = weight.reshape(C_out, C_in)   # no transpose needed in this layout
    b_mat = bias.reshape(C_out, 1)

    grid = (N // bn, n_tiles)
    kernel = _make_kernel(C_in, C_out, bn, use_mxu=(C_in >= _MXU_MIN_K))

    w_itemsize = jnp.dtype(weight.dtype).itemsize
    cost = pl.CostEstimate(
        flops=2 * N * M_pad * C_in * C_out,
        transcendentals=0,
        bytes_accessed=(itemsize * N * M_pad * (C_in + C_out)
                        + w_itemsize * (C_in * C_out + C_out)),
    )

    out_3d = pl.pallas_call(
        kernel,
        out_shape=jax.ShapeDtypeStruct((N, C_out, M_pad), x_3d.dtype),
        grid_spec=pltpu.PrefetchScalarGridSpec(
            num_scalar_prefetch=0,
            grid=grid,
            in_specs=[
                pl.BlockSpec((bn, C_in, tile_m), lambda n, i: (n, 0, i)),
                pl.BlockSpec((C_out, C_in), lambda n, i: (0, 0)),   # resident
                pl.BlockSpec((C_out, 1), lambda n, i: (0, 0)),      # resident
            ],
            out_specs=pl.BlockSpec((bn, C_out, tile_m), lambda n, i: (n, 0, i)),
        ),
        compiler_params=pltpu.CompilerParams(
            dimension_semantics=("parallel", "parallel"),
            vmem_limit_bytes=_VMEM_LIMIT_BYTES,
        ),
        cost_estimate=cost,
    )(x_3d, w_mat, b_mat)

    out = out_3d[:, :, :M] if M_pad != M else out_3d
    return out.reshape(N, C_out, H, W)


if __name__ == "__main__":
    key = jax.random.PRNGKey(0)
    k_x, k_w, k_b = jax.random.split(key, 3)

    N, C_in, C_out, Hs, Ws = 2, 4, 3, 16, 16

    # Deterministic parameter init (mimic PyTorch Conv2d default: uniform in
    # [-1/sqrt(fan_in), 1/sqrt(fan_in)] with fan_in = C_in * 1 * 1).
    bound = 1.0 / jnp.sqrt(jnp.float32(C_in))
    weight = jax.random.uniform(k_w, (C_out, C_in, 1, 1), jnp.float32,
                                minval=-bound, maxval=bound)
    bias = jax.random.uniform(k_b, (C_out,), jnp.float32,
                              minval=-bound, maxval=bound)

    x = jax.random.normal(k_x, (N, C_in, Hs, Ws), jnp.float32)

    out = outconv_forward(x, weight, bias)
    out = jax.block_until_ready(out)

    # Reference check against plain-JAX conv (lax.conv == PyTorch NCHW conv).
    ref = jax.lax.conv_general_dilated(
        x, weight, window_strides=(1, 1), padding="VALID",
        dimension_numbers=("NCHW", "OIHW", "NCHW"),
    ) + bias.reshape(1, C_out, 1, 1)
    assert out.shape == (N, C_out, Hs, Ws)
    assert jnp.allclose(out, ref, atol=1e-5, rtol=1e-5)

    print("KERNEL_OK")
</pallas_src>

<mosaic_0001>
module attributes {stable_mosaic.version = 11 : i64} {
  func.func @kernel(%arg0: i32, %arg1: i32, %arg2: memref<2x4x256xf32, #tpu.memory_space<vmem>>, %arg3: memref<3x4xf32, #tpu.memory_space<vmem>>, %arg4: memref<3x1xf32, #tpu.memory_space<vmem>>, %arg5: memref<2x3x256xf32, #tpu.memory_space<vmem>>) attributes {dimension_semantics = [#tpu.dimension_semantics<parallel>, #tpu.dimension_semantics<parallel>], iteration_bounds = array<i64: 1, 1>, scalar_prefetch = 0 : i64, scratch_operands = 0 : i64, tpu.core_type = #tpu.core_type<tc>, window_params = [{transform_indices = @transform_0, window_bounds = array<i64: 2, 4, 256>}, {pipeline_mode = #tpu.pipeline_mode<synchronous>, transform_indices = @transform_1, window_bounds = array<i64: 3, 4>}, {pipeline_mode = #tpu.pipeline_mode<synchronous>, transform_indices = @transform_2, window_bounds = array<i64: 3, 1>}, {transform_indices = @transform_3, window_bounds = array<i64: 2, 3, 256>}]} {
    %c0 = arith.constant 0 : index
    %c0_0 = arith.constant 0 : index
    %0 = vector.load %arg3[%c0, %c0_0] : memref<3x4xf32, #tpu.memory_space<vmem>>, vector<3x4xf32>
    %c0_1 = arith.constant 0 : index
    %c0_2 = arith.constant 0 : index
    %1 = vector.load %arg4[%c0_1, %c0_2] : memref<3x1xf32, #tpu.memory_space<vmem>>, vector<3x1xf32>
    %c0_3 = arith.constant 0 : index
    %c0_4 = arith.constant 0 : index
    %c0_5 = arith.constant 0 : index
    %2 = vector.load %arg2[%c0_3, %c0_4, %c0_5] : memref<2x4x256xf32, #tpu.memory_space<vmem>>, vector<2x4x256xf32>
    %3 = vector.extract_strided_slice %0 {offsets = [0, 0], sizes = [3, 1], strides = [1, 1]} : vector<3x4xf32> to vector<3x1xf32>
    %4 = vector.shape_cast %3 : vector<3x1xf32> to vector<1x3x1xf32>
    %5 = vector.extract_strided_slice %2 {offsets = [0, 0, 0], sizes = [2, 1, 256], strides = [1, 1, 1]} : vector<2x4x256xf32> to vector<2x1x256xf32>
    %6 = vector.broadcast %4 : vector<1x3x1xf32> to vector<2x3x256xf32>
    %7 = vector.broadcast %5 : vector<2x1x256xf32> to vector<2x3x256xf32>
    %8 = arith.mulf %6, %7 : vector<2x3x256xf32>
    %9 = vector.shape_cast %1 : vector<3x1xf32> to vector<1x3x1xf32>
    %10 = vector.broadcast %9 : vector<1x3x1xf32> to vector<2x3x256xf32>
    %11 = arith.addf %8, %10 : vector<2x3x256xf32>
    %12 = vector.extract_strided_slice %0 {offsets = [0, 1], sizes = [3, 1], strides = [1, 1]} : vector<3x4xf32> to vector<3x1xf32>
    %13 = vector.shape_cast %12 : vector<3x1xf32> to vector<1x3x1xf32>
    %14 = vector.extract_strided_slice %2 {offsets = [0, 1, 0], sizes = [2, 1, 256], strides = [1, 1, 1]} : vector<2x4x256xf32> to vector<2x1x256xf32>
    %15 = vector.broadcast %13 : vector<1x3x1xf32> to vector<2x3x256xf32>
    %16 = vector.broadcast %14 : vector<2x1x256xf32> to vector<2x3x256xf32>
    %17 = arith.mulf %15, %16 : vector<2x3x256xf32>
    %18 = arith.addf %11, %17 : vector<2x3x256xf32>
    %19 = vector.extract_strided_slice %0 {offsets = [0, 2], sizes = [3, 1], strides = [1, 1]} : vector<3x4xf32> to vector<3x1xf32>
    %20 = vector.shape_cast %19 : vector<3x1xf32> to vector<1x3x1xf32>
    %21 = vector.extract_strided_slice %2 {offsets = [0, 2, 0], sizes = [2, 1, 256], strides = [1, 1, 1]} : vector<2x4x256xf32> to vector<2x1x256xf32>
    %22 = vector.broadcast %20 : vector<1x3x1xf32> to vector<2x3x256xf32>
    %23 = vector.broadcast %21 : vector<2x1x256xf32> to vector<2x3x256xf32>
    %24 = arith.mulf %22, %23 : vector<2x3x256xf32>
    %25 = arith.addf %18, %24 : vector<2x3x256xf32>
    %26 = vector.extract_strided_slice %0 {offsets = [0, 3], sizes = [3, 1], strides = [1, 1]} : vector<3x4xf32> to vector<3x1xf32>
    %27 = vector.shape_cast %26 : vector<3x1xf32> to vector<1x3x1xf32>
    %28 = vector.extract_strided_slice %2 {offsets = [0, 3, 0], sizes = [2, 1, 256], strides = [1, 1, 1]} : vector<2x4x256xf32> to vector<2x1x256xf32>
    %29 = vector.broadcast %27 : vector<1x3x1xf32> to vector<2x3x256xf32>
    %30 = vector.broadcast %28 : vector<2x1x256xf32> to vector<2x3x256xf32>
    %31 = arith.mulf %29, %30 : vector<2x3x256xf32>
    %32 = arith.addf %25, %31 : vector<2x3x256xf32>
    %c0_6 = arith.constant 0 : index
    %c0_7 = arith.constant 0 : index
    %c0_8 = arith.constant 0 : index
    %33 = vector.load %arg5[%c0_6, %c0_7, %c0_8] : memref<2x3x256xf32, #tpu.memory_space<vmem>>, vector<2x3x256xf32>
    tpu.vector_store %arg5[%c0_6, %c0_7, %c0_8], %32 {strides = array<i32>} : memref<2x3x256xf32, #tpu.memory_space<vmem>>, vector<2x3x256xf32>,
    return
  }
  func.func @transform_0(%arg0: i32, %arg1: i32) -> (i32, i32, i32) {
    %c0_i32 = arith.constant 0 : i32
    %c0_i32_0 = arith.constant 0 : i32
    return %arg0, %c0_i32, %arg1 : i32, i32, i32
  }
  func.func @transform_1(%arg0: i32, %arg1: i32) -> (i32, i32) {
    %c0_i32 = arith.constant 0 : i32
    %c0_i32_0 = arith.constant 0 : i32
    %c0_i32_1 = arith.constant 0 : i32
    return %c0_i32, %c0_i32_0 : i32, i32
  }
  func.func @transform_2(%arg0: i32, %arg1: i32) -> (i32, i32) {
    %c0_i32 = arith.constant 0 : i32
    %c0_i32_0 = arith.constant 0 : i32
    %c0_i32_1 = arith.constant 0 : i32
    return %c0_i32, %c0_i32_0 : i32, i32
  }
  func.func @transform_3(%arg0: i32, %arg1: i32) -> (i32, i32, i32) {
    %c0_i32 = arith.constant 0 : i32
    %c0_i32_0 = arith.constant 0 : i32
    return %arg0, %c0_i32, %arg1 : i32, i32, i32
  }
}

</mosaic_0001>

<bundles_post_ra>
// kernel: tpu_custom_call.1
= control target key start
LH: loop header
LB: loop body
LE: loop exit
PB: predicated region body
PF: predicated region fallthrough
CT: control target
= control target key end

     0   :  { %8 = vsyncpa [#allocation3], 0  ;;  %s282_s12 = smov [#allocation2]   ;;  %s341_s0 = inlined_call_operand.hbm [shape: f32[2,4,256], index: 0, kind: input, shape index: {}]   ;;  %s342_s1 = inlined_call_operand.vmem [shape: f32[3,4], index: 1, kind: input, shape index: {}]   ;;  %s343_s2 = inlined_call_operand.vmem [shape: f32[3,1], index: 2, kind: input, shape index: {}]   ;;  %s344_s3 = inlined_call_operand.vmem [shape: f32[2,3,256], index: 3, kind: output, shape index: {}]  }
   0x1   :  { %s14_s13 = sshll.u32 %s282_s12, 4  ;;  %s258_s16 = scalar_lea.hbm %s341_s0, 256  ;;  %s15_s13 = int_to_ptr.vmem [resolvable:$true] %s14_s13 }
   0x2   :  { %p259_p0 = scmp.ne.s32.totalorder %s341_s0, %s258_s16  ;;  %p262_p1 = scmp.lt.u32.totalorder %s258_s16, %s341_s0 }
   0x4   :  { %p264_p2 = pnand %p262_p1, %p259_p0 }
   0x6   :  { %267 = shalt.err (!%p264_p2)
}
   0x7   :  { %s268_s21 = scalar_lea.vmem %s15_s13, 256  ;;  %p273_p4 = scmp.lt.s32.totalorder %s15_s13, %s15_s13 }
   0x8   :  { %p269_p3 = scmp.ne.s32.totalorder %s15_s13, %s268_s21  ;;  %p274_p5 = scmp.lt.s32.totalorder %s268_s21, %s268_s21 }
   0xa   :  { %p275_p6 = por %p274_p5, %p273_p4 }
   0xc   :  { %p276_p7 = pnand %p275_p6, %p269_p3 }
   0xe   :  { %279 = shalt.err (!%p276_p7)
}
   0xf   :  { %s283_s22 = smov 128   ;;  %s284_s23 = smov 8  }
  0x10   :  { %20 = dma.hbm_to_vmem [thread:$0]  %s341_s0, 256, %s15_s13, [#allocation3], %s283_s22, %s283_s22, %s284_s23  }
  0x11   :  { %280 = dma.done.wait [#allocation3], 256  }
  0x12   :  { %281 = vsyncadd [#allocation3], 4294967040  ;;  %v285_v0 = vmov 0   ;;  %v286_v1 = vmov 1   ;;  %v28_v2 = vld [vmem:[%s342_s1] sm:$0x7]  ;;  %v39_v6 = vlaneseq }
  0x13   :  { %254 = vset.pattern.permute.xlu0 %v285_v0  ;;  %255 = vset.pattern.permute.xlu1 %v286_v1  ;;  %v29_v3 = vld [vmem:[%s343_s2] sm:$0x7]  ;;  %v287_v4 = vmov 2   ;;  %v288_v5 = vmov 3   ;;  %v31_v11 = vld [vmem:[#allocation2 + $0x8] sm:$0xff] }
  0x14   :  { %34 = vperm.xlu0 %254, %v28_v2   ;;  %89 = vperm.xlu1 %255, %v28_v2   ;;  %v40_v7 = vshrl.u32 %v39_v6, 7  ;;  %v30_v10 = vld [vmem:[#allocation2] sm:$0xff] }
  0x16   :  { %v41_v8 = vsub.s32 0, %v40_v7  ;;  %v45_v9 = vsub.s32 4, %v40_v7  ;;  %v94_v12 = vsub.s32 1, %v40_v7  ;;  %v98_v13 = vsub.s32 5, %v40_v7 }
  0x17   :  { %v142_v14 = vsub.s32 2, %v40_v7  ;;  %v146_v15 = vsub.s32 6, %v40_v7  ;;  %v327_v16 = vsub.s32 3, %v40_v7  ;;  %v194_v17 = vsub.s32 7, %v40_v7 }
  0x18   :  { %81 = vperm.xlu0 %254, %v29_v3   ;;  %256 = vset.pattern.permute.xlu1 %v287_v4  ;;  %v42_v18 = vrot.slane %v30_v10, %v41_v8  ;;  %v46_v19 = vrot.slane %v30_v10, %v45_v9  ;;  %v50_v20 = vrot.slane %v31_v11, %v41_v8 }
  0x19   :  { %137 = vperm.xlu1 %256, %v28_v2   ;;  %v54_v21 = vrot.slane %v31_v11, %v45_v9  ;;  %v95_v22 = vrot.slane %v30_v10, %v94_v12  ;;  %v99_v23 = vrot.slane %v30_v10, %v98_v13  ;;  %v103_v24 = vrot.slane %v31_v11, %v94_v12 }
  0x1a   :  { %v107_v25 = vrot.slane %v31_v11, %v98_v13  ;;  %v143_v26 = vrot.slane %v30_v10, %v142_v14  ;;  %v147_v27 = vrot.slane %v30_v10, %v146_v15  ;;  %v151_v28 = vrot.slane %v31_v11, %v142_v14 }
  0x1b   :  { %v155_v29 = vrot.slane %v31_v11, %v146_v15  ;;  %v191_v30 = vrot.slane %v30_v10, %v327_v16  ;;  %v195_v31 = vrot.slane %v30_v10, %v194_v17  ;;  %v199_v32 = vrot.slane %v31_v11, %v327_v16 }
  0x1c   :  { %257 = vset.pattern.permute.xlu0 %v288_v5  ;;  %v203_v33 = vrot.slane %v31_v11, %v194_v17  ;;  %v62_v34 = vrot.slane %v42_v18, %v41_v8  ;;  %v66_v35 = vrot.slane %v46_v19, %v41_v8  ;;  %v70_v36 = vrot.slane %v50_v20, %v41_v8 }
  0x1d   :  { %185 = vperm.xlu0 %257, %v28_v2   ;;  %v74_v37 = vrot.slane %v54_v21, %v41_v8  ;;  %v115_v39 = vrot.slane %v95_v22, %v94_v12  ;;  %v119_v40 = vrot.slane %v99_v23, %v94_v12  ;;  %v123_v41 = vrot.slane %v103_v24, %v94_v12 }
  0x1e   :  { %v127_v42 = vrot.slane %v107_v25, %v94_v12  ;;  %v163_v44 = vrot.slane %v143_v26, %v142_v14  ;;  %v167_v45 = vrot.slane %v147_v27, %v142_v14  ;;  %v171_v46 = vrot.slane %v151_v28, %v142_v14 }
  0x1f   :  { %v175_v47 = vrot.slane %v155_v29, %v142_v14  ;;  %v211_v48 = vrot.slane %v191_v30, %v327_v16  ;;  %v215_v49 = vrot.slane %v195_v31, %v327_v16  ;;  %v219_v50 = vrot.slane %v199_v32, %v327_v16 }
  0x20   :  { %v223_v51 = vrot.slane %v203_v33, %v327_v16 }
  0x93   :  { %v35_v38 = vpop.permute.xlu0 %34  ;;  %v90_v43 = vpop.permute.xlu1 %89 }
  0x94   :  { %v75_v52 = vmul.f32 %v62_v34, %v35_v38  ;;  %v76_v53 = vmul.f32 %v66_v35, %v35_v38  ;;  %v77_v54 = vmul.f32 %v70_v36, %v35_v38  ;;  %v78_v55 = vmul.f32 %v74_v37, %v35_v38 }
  0x95   :  { %v128_v56 = vmul.f32 %v115_v39, %v90_v43  ;;  %v129_v57 = vmul.f32 %v119_v40, %v90_v43  ;;  %v130_v58 = vmul.f32 %v123_v41, %v90_v43  ;;  %v131_v59 = vmul.f32 %v127_v42, %v90_v43 }
  0x97   :  { %v82_v60 = vpop.permute.xlu0 %81 }
  0x98   :  { %v84_v61 = vadd.f32 %v82_v60, %v75_v52  ;;  %v85_v62 = vadd.f32 %v82_v60, %v76_v53  ;;  %v86_v63 = vadd.f32 %v82_v60, %v77_v54  ;;  %v87_v0 = vadd.f32 %v82_v60, %v78_v55  ;;  %v138_v1 = vpop.permute.xlu1 %137 }
  0x99   :  { %v176_v2 = vmul.f32 %v163_v44, %v138_v1  ;;  %v177_v3 = vmul.f32 %v167_v45, %v138_v1  ;;  %v178_v4 = vmul.f32 %v171_v46, %v138_v1  ;;  %v179_v5 = vmul.f32 %v175_v47, %v138_v1 }
  0x9a   :  { %v132_v6 = vadd.f32 %v128_v56, %v84_v61  ;;  %v133_v7 = vadd.f32 %v129_v57, %v85_v62  ;;  %v134_v8 = vadd.f32 %v130_v58, %v86_v63  ;;  %v135_v9 = vadd.f32 %v131_v59, %v87_v0 }
  0x9c   :  { %v180_v10 = vadd.f32 %v176_v2, %v132_v6  ;;  %v181_v11 = vadd.f32 %v177_v3, %v133_v7  ;;  %v182_v12 = vadd.f32 %v178_v4, %v134_v8  ;;  %v183_v13 = vadd.f32 %v179_v5, %v135_v9  ;;  %v186_v14 = vpop.permute.xlu0 %185 }
  0x9d   :  { %v224_v15 = vmul.f32 %v211_v48, %v186_v14  ;;  %v225_v16 = vmul.f32 %v215_v49, %v186_v14  ;;  %v226_v17 = vmul.f32 %v219_v50, %v186_v14  ;;  %v227_v18 = vmul.f32 %v223_v51, %v186_v14 }
  0x9f   :  { %v228_v19 = vadd.f32 %v224_v15, %v180_v10  ;;  %v229_v20 = vadd.f32 %v225_v16, %v181_v11  ;;  %v230_v21 = vadd.f32 %v226_v17, %v182_v12  ;;  %v231_v22 = vadd.f32 %v227_v18, %v183_v13 }
  0xa1   :  { %v236_v23 = vcombine.low %v228_v19, %v229_v20  ;;  %v237_v24 = vcombine.low %v230_v21, %v231_v22 }
  0xa3   :  { %240 = vst [vmem:[%s344_s3] sm:$0x77] %v236_v23  ;;  %241 = vst [vmem:[%s344_s3 + $0x8] sm:$0x77] %v237_v24 }
  0xa4   :  { %246 = vsyncpa [#allocation3], 1 }

</bundles_post_ra>
